<compile_context>
chip_gen: v7x
topology: tpu7x:2x2x1
jax: 0.10.0
libtpu: 0.0.40
codegen_flags: <defaults>
</compile_context>

<pallas_src>
import functools

import jax
import jax.numpy as jnp
from jax.experimental import pallas as pl
from jax.experimental.pallas import tpu as pltpu


def _rbf_kernel(coef_ref, b_ref, x_ref, w_ref, o_ref, *, n_basis, use_recurrence):
    # coef_ref: SMEM (4,) f32 -> [d0, -gamma, 2*gamma*delta, u_clamp]
    # b_ref:    SMEM (N,) f32 -> 2*gamma*d_j            (direct path only)
    # x_ref:    VMEM (TR, 128) f32  lane-dense slab of the flattened input
    # w_ref:    VMEM (N, 128)  f32  lane-tiled weights with per-basis consts folded in
    # o_ref:    VMEM (TR, 128) f32
    x = x_ref[...]
    if use_recurrence:
        d0 = coef_ref[0]
        neg_g = coef_ref[1]
        two_g_delta = coef_ref[2]
        u_max = coef_ref[3]
        u = jnp.clip(x - d0, -u_max, u_max)      # clamp keeps R finite (no 0*inf NaN)
        r = jnp.exp(neg_g * u * u)               # E0 = term_0  (c_0 = 1)
        ratio = jnp.exp(two_g_delta * u)         # R
        acc = r * w_ref[0:1, :]                  # init with j=0 term
        for j in range(1, n_basis):              # small static N -> fully unrolled
            r = r * ratio                        # E0 * R^j   (c_j folded into w)
            acc = acc + r * w_ref[j:j + 1, :]    # (1,128) sublane-broadcast row
    else:
        # Always-safe direct form (strength-reduced): exp(-g*x^2 + 2*g*d_j*x) * w'_j
        neg_g = coef_ref[1]
        q = (neg_g * x) * x                      # -g*x^2, once per tile
        acc = jnp.exp(b_ref[0] * x + q) * w_ref[0:1, :]
        for j in range(1, n_basis):
            acc = acc + jnp.exp(b_ref[j] * x + q) * w_ref[j:j + 1, :]
    o_ref[...] = acc


def kernel_activation(x, dict_vals, gamma, weight, *, max_tile_rows=4096):
    """x: (B, C), dict_vals: (N,), gamma: scalar, weight: (C, N). Returns (B, C)."""
    B, C = x.shape
    n_basis = dict_vals.shape[0]
    orig_dtype = x.dtype

    g = jnp.asarray(gamma, jnp.float32).reshape(())
    d = dict_vals.astype(jnp.float32)
    w32 = weight.astype(jnp.float32)

    d0 = d[0]
    delta = (d[-1] - d[0]) / jnp.float32(max(n_basis - 1, 1))

    # For small n_basis the 2-exp recurrence (with the clamp below) is exact in f32;
    # for large n_basis fall back to the direct per-basis exp (always safe).
    use_recurrence = n_basis <= 12

    jj = jnp.arange(n_basis, dtype=jnp.float32)
    if use_recurrence:
        w_eff = w32 * jnp.exp(-g * (delta * jj) ** 2)[None, :]   # fold c_j into weights
        b_coef = jnp.zeros((n_basis,), jnp.float32)              # unused on this path
    else:
        w_eff = w32 * jnp.exp(-g * d * d)[None, :]               # fold exp(-g*d_j^2)
        b_coef = (2.0 * g) * d

    # Clamp |x - d0| so exp(2*g*delta*(x-d0)) stays finite; beyond the clamp every
    # basis response underflows to 0 anyway (for n_basis <= 12 with module's gamma).
    u_max = jnp.float32(85.0) / jnp.maximum(jnp.abs(2.0 * g * delta), jnp.float32(1e-30))
    coef = jnp.stack([d0, -g, 2.0 * g * delta, u_max]).astype(jnp.float32)

    # ---- Lane-dense flat layout: channel of lane l is l % C_pad (needs C_pad | 128).
    c_pad = pl.next_power_of_2(max(C, 1))
    if c_pad > 128:
        # TODO(synk): channels > 128 would need a 2-D grid with per-channel-block
        # weight indexing; not needed for this module (channels=4).
        raise NotImplementedError("kernel_activation: channels > 128 not supported")
    x32 = x.astype(jnp.float32)
    if c_pad != C:
        x32 = jnp.pad(x32, ((0, 0), (0, c_pad - C)))
        w_eff = jnp.pad(w_eff, ((0, c_pad - C), (0, 0)))
    w_lanes = jnp.tile(w_eff.T, (1, 128 // c_pad))               # (N, 128)

    total = B * c_pad
    rows = -(-total // 128)
    # Tile sizing: ~2 MiB tiles; when there is enough work use >=4 tiles so both
    # v7x TensorCores get >=2 tiles each and the DMA pipeline stays full; choose
    # tile count first to minimize tail padding.
    ntiles = max(1, -(-rows // max_tile_rows))
    if ntiles < 4 and rows >= 4096:
        ntiles = 4
    tile_rows = 8 * (-(-rows // (8 * ntiles)))                   # multiple of 8
    rows_pad = tile_rows * ntiles

    flat = x32.reshape(-1)                                       # free row-major reshape
    if rows_pad * 128 != total:
        flat = jnp.pad(flat, (0, rows_pad * 128 - total))
    x2d = flat.reshape(rows_pad, 128)

    kernel = functools.partial(
        _rbf_kernel, n_basis=n_basis, use_recurrence=use_recurrence)

    n_exp = 2 if use_recurrence else n_basis
    cost = pl.CostEstimate(
        flops=rows_pad * 128 * (4 * n_basis),
        transcendentals=rows_pad * 128 * n_exp,
        bytes_accessed=rows_pad * 128 * 4 * 2,
    )

    out2d = pl.pallas_call(
        kernel,
        out_shape=jax.ShapeDtypeStruct((rows_pad, 128), jnp.float32),
        grid_spec=pltpu.PrefetchScalarGridSpec(
            num_scalar_prefetch=0,
            grid=(ntiles,),
            in_specs=[
                pl.BlockSpec(memory_space=pltpu.MemorySpace.SMEM),   # coef (4,)
                pl.BlockSpec(memory_space=pltpu.MemorySpace.SMEM),   # b_j  (N,)
                pl.BlockSpec((tile_rows, 128), lambda i: (i, 0)),    # x slab tile
                pl.BlockSpec((n_basis, 128), lambda i: (0, 0)),      # weights (resident)
            ],
            out_specs=pl.BlockSpec((tile_rows, 128), lambda i: (i, 0)),
        ),
        compiler_params=pltpu.CompilerParams(
            # TODO(synk): on v7x, CORE_PARALLEL here would shard tiles across both
            # TensorCores; kept as "parallel" for portability across v5e/v6e/v7x.
            dimension_semantics=("parallel",),
            vmem_limit_bytes=32 * 1024 * 1024,
        ),
        cost_estimate=cost,
    )(coef, b_coef, x2d, w_lanes)

    out = out2d.reshape(-1)[:total].reshape(B, c_pad)
    if c_pad != C:
        out = out[:, :C]
    return out.astype(orig_dtype)


if __name__ == "__main__":
    # Module config: n_basis=8, span=3, channels=4 (forward takes x of shape (B, C)).
    n_basis, span = 8, 3.0
    key = jax.random.PRNGKey(0)

    dict_vals = jnp.linspace(-span, span, n_basis, dtype=jnp.float32)
    gamma = 1.0 / (6.0 * (dict_vals[-1] - dict_vals[-2]) ** 2)

    def reference(x, w):
        # Pure-JAX reference of the PyTorch forward.
        phi = jnp.exp(-gamma * (x[:, :, None] - dict_vals[None, None, :]) ** 2)  # (B,C,N)
        return jnp.sum(phi * w[None, :, :], axis=-1)                             # (B,C)

    # Small module-sized case + cases exercising channel padding, row padding and
    # the multi-tile grid path.
    for i, (B, C) in enumerate(((2, 4), (517, 3), (140000, 4))):
        kx, kw = jax.random.split(jax.random.fold_in(key, i))
        x = jax.random.normal(kx, (B, C), dtype=jnp.float32)
        weight = 0.1 * jax.random.normal(kw, (C, n_basis), dtype=jnp.float32)

        out = jax.block_until_ready(kernel_activation(x, dict_vals, gamma, weight))
        ref = reference(x, weight)

        assert out.shape == (B, C)
        assert jnp.allclose(out, ref, atol=2e-5, rtol=1e-5), (
            "max abs err:", float(jnp.max(jnp.abs(out - ref))))

    print("KERNEL_OK")
</pallas_src>

<mosaic_0001>
module attributes {stable_mosaic.version = 11 : i64} {
  func.func @_rbf_kernel(%arg0: i32, %arg1: memref<4xf32, #tpu.memory_space<smem>>, %arg2: memref<8xf32, #tpu.memory_space<smem>>, %arg3: memref<8x128xf32, #tpu.memory_space<vmem>>, %arg4: memref<8x128xf32, #tpu.memory_space<vmem>>, %arg5: memref<8x128xf32, #tpu.memory_space<vmem>>) attributes {dimension_semantics = [#tpu.dimension_semantics<parallel>], iteration_bounds = array<i64: 1>, scalar_prefetch = 0 : i64, scratch_operands = 0 : i64, tpu.core_type = #tpu.core_type<tc>, window_params = [{transform_indices = @transform_0, window_bounds = array<i64: 4>}, {transform_indices = @transform_1, window_bounds = array<i64: 8>}, {transform_indices = @transform_2, window_bounds = array<i64: 8, 128>}, {pipeline_mode = #tpu.pipeline_mode<synchronous>, transform_indices = @transform_3, window_bounds = array<i64: 8, 128>}, {transform_indices = @transform_4, window_bounds = array<i64: 8, 128>}]} {
    %c0 = arith.constant 0 : index
    %c0_0 = arith.constant 0 : index
    %0 = vector.load %arg3[%c0, %c0_0] : memref<8x128xf32, #tpu.memory_space<vmem>>, vector<8x128xf32>
    %c0_1 = arith.constant 0 : index
    %1 = memref.load %arg1[%c0_1] : memref<4xf32, #tpu.memory_space<smem>>
    %c1 = arith.constant 1 : index
    %2 = memref.load %arg1[%c1] : memref<4xf32, #tpu.memory_space<smem>>
    %c2 = arith.constant 2 : index
    %3 = memref.load %arg1[%c2] : memref<4xf32, #tpu.memory_space<smem>>
    %c3 = arith.constant 3 : index
    %4 = memref.load %arg1[%c3] : memref<4xf32, #tpu.memory_space<smem>>
    %5 = vector.broadcast %1 : f32 to vector<8x128xf32>
    %6 = arith.subf %0, %5 : vector<8x128xf32>
    %cst = arith.constant 0.000000e+00 : f32
    %7 = arith.subf %cst, %4 : f32
    %8 = vector.broadcast %7 : f32 to vector<8x128xf32>
    %9 = arith.maximumf %8, %6 : vector<8x128xf32>
    %10 = vector.broadcast %4 : f32 to vector<8x128xf32>
    %11 = arith.minimumf %10, %9 : vector<8x128xf32>
    %12 = vector.broadcast %2 : f32 to vector<8x128xf32>
    %13 = arith.mulf %12, %11 : vector<8x128xf32>
    %14 = arith.mulf %13, %11 : vector<8x128xf32>
    %15 = math.exp %14 : vector<8x128xf32>
    %16 = vector.broadcast %3 : f32 to vector<8x128xf32>
    %17 = arith.mulf %16, %11 : vector<8x128xf32>
    %18 = math.exp %17 : vector<8x128xf32>
    %c0_2 = arith.constant 0 : index
    %c0_3 = arith.constant 0 : index
    %19 = vector.load %arg4[%c0_2, %c0_3] : memref<8x128xf32, #tpu.memory_space<vmem>>, vector<1x128xf32>
    %20 = vector.broadcast %19 : vector<1x128xf32> to vector<8x128xf32>
    %21 = arith.mulf %15, %20 : vector<8x128xf32>
    %22 = arith.mulf %15, %18 : vector<8x128xf32>
    %c1_4 = arith.constant 1 : index
    %c0_5 = arith.constant 0 : index
    %23 = vector.load %arg4[%c1_4, %c0_5] : memref<8x128xf32, #tpu.memory_space<vmem>>, vector<1x128xf32>
    %24 = vector.broadcast %23 : vector<1x128xf32> to vector<8x128xf32>
    %25 = arith.mulf %22, %24 : vector<8x128xf32>
    %26 = arith.addf %21, %25 : vector<8x128xf32>
    %27 = arith.mulf %22, %18 : vector<8x128xf32>
    %c2_6 = arith.constant 2 : index
    %c0_7 = arith.constant 0 : index
    %28 = vector.load %arg4[%c2_6, %c0_7] : memref<8x128xf32, #tpu.memory_space<vmem>>, vector<1x128xf32>
    %29 = vector.broadcast %28 : vector<1x128xf32> to vector<8x128xf32>
    %30 = arith.mulf %27, %29 : vector<8x128xf32>
    %31 = arith.addf %26, %30 : vector<8x128xf32>
    %32 = arith.mulf %27, %18 : vector<8x128xf32>
    %c3_8 = arith.constant 3 : index
    %c0_9 = arith.constant 0 : index
    %33 = vector.load %arg4[%c3_8, %c0_9] : memref<8x128xf32, #tpu.memory_space<vmem>>, vector<1x128xf32>
    %34 = vector.broadcast %33 : vector<1x128xf32> to vector<8x128xf32>
    %35 = arith.mulf %32, %34 : vector<8x128xf32>
    %36 = arith.addf %31, %35 : vector<8x128xf32>
    %37 = arith.mulf %32, %18 : vector<8x128xf32>
    %c4 = arith.constant 4 : index
    %c0_10 = arith.constant 0 : index
    %38 = vector.load %arg4[%c4, %c0_10] : memref<8x128xf32, #tpu.memory_space<vmem>>, vector<1x128xf32>
    %39 = vector.broadcast %38 : vector<1x128xf32> to vector<8x128xf32>
    %40 = arith.mulf %37, %39 : vector<8x128xf32>
    %41 = arith.addf %36, %40 : vector<8x128xf32>
    %42 = arith.mulf %37, %18 : vector<8x128xf32>
    %c5 = arith.constant 5 : index
    %c0_11 = arith.constant 0 : index
    %43 = vector.load %arg4[%c5, %c0_11] : memref<8x128xf32, #tpu.memory_space<vmem>>, vector<1x128xf32>
    %44 = vector.broadcast %43 : vector<1x128xf32> to vector<8x128xf32>
    %45 = arith.mulf %42, %44 : vector<8x128xf32>
    %46 = arith.addf %41, %45 : vector<8x128xf32>
    %47 = arith.mulf %42, %18 : vector<8x128xf32>
    %c6 = arith.constant 6 : index
    %c0_12 = arith.constant 0 : index
    %48 = vector.load %arg4[%c6, %c0_12] : memref<8x128xf32, #tpu.memory_space<vmem>>, vector<1x128xf32>
    %49 = vector.broadcast %48 : vector<1x128xf32> to vector<8x128xf32>
    %50 = arith.mulf %47, %49 : vector<8x128xf32>
    %51 = arith.addf %46, %50 : vector<8x128xf32>
    %52 = arith.mulf %47, %18 : vector<8x128xf32>
    %c7 = arith.constant 7 : index
    %c0_13 = arith.constant 0 : index
    %53 = vector.load %arg4[%c7, %c0_13] : memref<8x128xf32, #tpu.memory_space<vmem>>, vector<1x128xf32>
    %54 = vector.broadcast %53 : vector<1x128xf32> to vector<8x128xf32>
    %55 = arith.mulf %52, %54 : vector<8x128xf32>
    %56 = arith.addf %51, %55 : vector<8x128xf32>
    %c0_14 = arith.constant 0 : index
    %c0_15 = arith.constant 0 : index
    %57 = vector.load %arg5[%c0_14, %c0_15] : memref<8x128xf32, #tpu.memory_space<vmem>>, vector<8x128xf32>
    tpu.vector_store %arg5[%c0_14, %c0_15], %56 {strides = array<i32>} : memref<8x128xf32, #tpu.memory_space<vmem>>, vector<8x128xf32>,
    return
  }
  func.func @transform_0(%arg0: i32) -> i32 {
    %c0_i32 = arith.constant 0 : i32
    %c0_i32_0 = arith.constant 0 : i32
    return %c0_i32 : i32
  }
  func.func @transform_1(%arg0: i32) -> i32 {
    %c0_i32 = arith.constant 0 : i32
    %c0_i32_0 = arith.constant 0 : i32
    return %c0_i32 : i32
  }
  func.func @transform_2(%arg0: i32) -> (i32, i32) {
    %c0_i32 = arith.constant 0 : i32
    %c0_i32_0 = arith.constant 0 : i32
    return %arg0, %c0_i32 : i32, i32
  }
  func.func @transform_3(%arg0: i32) -> (i32, i32) {
    %c0_i32 = arith.constant 0 : i32
    %c0_i32_0 = arith.constant 0 : i32
    %c0_i32_1 = arith.constant 0 : i32
    return %c0_i32, %c0_i32_0 : i32, i32
  }
  func.func @transform_4(%arg0: i32) -> (i32, i32) {
    %c0_i32 = arith.constant 0 : i32
    %c0_i32_0 = arith.constant 0 : i32
    return %arg0, %c0_i32 : i32, i32
  }
}

</mosaic_0001>

<bundles_post_ra>
// kernel: tpu_custom_call.1
= control target key start
LH: loop header
LB: loop body
LE: loop exit
PB: predicated region body
PF: predicated region fallthrough
CT: control target
= control target key end

     0   :  { %9 = vsyncpa [#allocation5], 0  ;;  %s339_s0 = inlined_call_operand.hbm [shape: f32[4], index: 0, kind: input, shape index: {}]   ;;  %s340_s1 = inlined_call_operand.vmem [shape: f32[8], index: 1, kind: input, shape index: {}]   ;;  %s341_s2 = inlined_call_operand.hbm [shape: f32[8,128], index: 2, kind: input, shape index: {}]   ;;  %s342_s3 = inlined_call_operand.vmem [shape: f32[8,128], index: 3, kind: input, shape index: {}]   ;;  %s343_s4 = inlined_call_operand.hbm [shape: f32[8,128], index: 4, kind: output, shape index: {}]  }
   0x1   :  { %10 = vsyncpa [#allocation6], 0 }
   0x2   :  { %11 = vsyncpa [#allocation3], 0 }
   0x3   :  { %12 = vsyncpa [#allocation4], 0  ;;  %s27_s17 = sshll.u32 %s340_s1, 4  ;;  %s173_s20 = scalar_lea.hbm %s339_s0, 16  ;;  %s28_s17 = int_to_ptr.vmem [resolvable:$true] %s27_s17 }
   0x4   :  { %p174_p0 = scmp.ne.s32.totalorder %s339_s0, %s173_s20  ;;  %p177_p1 = scmp.lt.u32.totalorder %s173_s20, %s339_s0 }
   0x6   :  { %p179_p2 = pnand %p177_p1, %p174_p0 }
   0x8   :  { %182 = shalt.err (!%p179_p2)
}
   0x9   :  { %s247_s25 = smov [#allocation2]   ;;  %s183_s1 = scalar_lea.vmem %s28_s17, 16 }
   0xa   :  { %20 = dma.hbm_to_smem %s339_s0, 16, %s247_s25, [#allocation5]  }
   0xb   :  { %p184_p3 = scmp.ne.s32.totalorder %s28_s17, %s183_s1  ;;  %p188_p4 = scmp.lt.s32.totalorder %s28_s17, %s28_s17 }
   0xc   :  { %p189_p5 = scmp.lt.s32.totalorder %s183_s1, %s183_s1 }
   0xe   :  { %p190_p6 = por %p189_p5, %p188_p4 }
  0x10   :  { %p191_p7 = pnand %p190_p6, %p184_p3 }
  0x12   :  { %194 = shalt.err (!%p191_p7)
}
  0x13   :  { %s248_s28 = smov [#allocation7]   ;;  %s249_s29 = smov [#allocation8]  }
  0x14   :  { %30 = dma.vmem_to_smem %s28_s17, 16, %s248_s28, [#allocation6]  }
  0x15   :  { %s37_s30 = sshll.u32 %s249_s29, 4  ;;  %s195_s7 = scalar_lea.hbm %s341_s2, 128  ;;  %s38_s30 = int_to_ptr.vmem [resolvable:$true] %s37_s30 }
  0x16   :  { %p196_p8 = scmp.ne.s32.totalorder %s341_s2, %s195_s7  ;;  %p199_p9 = scmp.lt.u32.totalorder %s195_s7, %s341_s2 }
  0x18   :  { %p201_p10 = pnand %p199_p9, %p196_p8 }
  0x1a   :  { %204 = shalt.err (!%p201_p10)
}
  0x1b   :  { %s205_s11 = scalar_lea.vmem %s38_s30, 128  ;;  %p210_p12 = scmp.lt.s32.totalorder %s38_s30, %s38_s30 }
  0x1c   :  { %p206_p11 = scmp.ne.s32.totalorder %s38_s30, %s205_s11  ;;  %p211_p13 = scmp.lt.s32.totalorder %s205_s11, %s205_s11 }
  0x1e   :  { %p212_p0 = por %p211_p13, %p210_p12 }
  0x20   :  { %p213_p1 = pnand %p212_p0, %p206_p11 }
  0x22   :  { %216 = shalt.err (!%p213_p1)
}
  0x23   :  { %40 = dma.hbm_to_vmem [thread:$0]  %s341_s2, 128, %s38_s30, [#allocation3]  }
  0x24   :  { %239 = dma.done.wait [#allocation5], 16  }
  0x25   :  { %240 = vsyncadd [#allocation5], 4294967280 }
  0x26   :  { %241 = dma.done.wait [#allocation6], 16  }
  0x27   :  { %242 = vsyncadd [#allocation6], 4294967280 }
  0x28   :  { %243 = dma.done.wait [#allocation3], 128  }
  0x29   :  { %244 = vsyncadd [#allocation3], 4294967168 }
  0x2a   :  { %52 = sfence }
  0x2b   :  { %s54_s14 = sld [smem:[#allocation2]]  ;;  %s156_s15 = sld [smem:[#allocation2 + $0x3]]  ;;  %v53_v0 = vld [vmem:[#allocation8] sm:$0xff]  ;;  %v157_v15 = vld [vmem:[%s342_s3] ss:$0 sm:$0xff] }
  0x2c   :  { %s154_s16 = sld [smem:[#allocation2 + $0x1]]  ;;  %s155_s17 = sld [smem:[#allocation2 + $0x2]]  ;;  %v158_v17 = vld [vmem:[%s342_s3 + $0x1] ss:$0 sm:$0xff]  ;;  %v159_v20 = vld [vmem:[%s342_s3 + $0x2] ss:$0 sm:$0xff] }
  0x2d   :  { %v160_v23 = vld [vmem:[%s342_s3 + $0x3] ss:$0 sm:$0xff]  ;;  %v161_v27 = vld [vmem:[%s342_s3 + $0x4] ss:$0 sm:$0xff]  ;;  %v162_v31 = vld [vmem:[%s342_s3 + $0x5] ss:$0 sm:$0xff] }
  0x2e   :  { %v163_v35 = vld [vmem:[%s342_s3 + $0x6] ss:$0 sm:$0xff]  ;;  %v164_v39 = vld [vmem:[%s342_s3 + $0x7] ss:$0 sm:$0xff]  ;;  %s250_s7 = smov [#allocation9]  }
  0x2f   :  { %s143_s8 = sshll.u32 %s250_s7, 4  ;;  %s144_s8 = int_to_ptr.vmem [resolvable:$true] %s143_s8 }
  0x30   :  { %s217_s9 = scalar_lea.vmem %s144_s8, 128  ;;  %p222_p3 = scmp.lt.s32.totalorder %s144_s8, %s144_s8 }
  0x31   :  { %v58_v1 = vstv %s54_s14  ;;  %s60_s18 = ssub.f32 0.0, %s156_s15  ;;  %v63_v4 = vstv %s156_s15  ;;  %p218_p2 = scmp.ne.s32.totalorder %s144_s8, %s217_s9 }
  0x32   :  { %v59_v2 = vsub.f32 %v53_v0, %v58_v1  ;;  %v65_v6 = vstv %s154_s16  ;;  %v70_v7 = vstv %s155_s17  ;;  %p223_p4 = scmp.lt.s32.totalorder %s217_s9, %s217_s9 }
  0x33   :  { %v61_v3 = vstv %s60_s18 }
  0x34   :  { %v62_v5 = vmax.f32 %v61_v3, %v59_v2  ;;  %p224_p5 = por %p223_p4, %p222_p3 }
  0x36   :  { %v64_v8 = vmin.f32 %v63_v4, %v62_v5  ;;  %p225_p6 = pnand %p224_p5, %p218_p2 }
  0x38   :  { %v66_v9 = vmul.f32 %v65_v6, %v64_v8  ;;  %v71_v10 = vmul.f32 %v70_v7, %v64_v8 }
  0x3a   :  { %v67_v11 = vmul.f32 %v66_v9, %v64_v8  ;;  %v72_v12 = vmul.f32 1.442695, %v71_v10 }
  0x3c   :  { %v68_v13 = vmul.f32 1.442695, %v67_v11  ;;  %169 = vpow2.f32 %v72_v12 }
  0x3e   :  { %171 = vpow2.f32 %v68_v13 }
  0x46   :  { %v170_v14 = vpop.eup %169 }
  0x48   :  { %v172_v16 = vpop.eup %171 }
  0x49   :  { %v79_v18 = vmul.f32 %v172_v16, %v157_v15  ;;  %v80_v19 = vmul.f32 %v172_v16, %v170_v14 }
  0x4b   :  { %v86_v21 = vmul.f32 %v158_v17, %v80_v19  ;;  %v88_v22 = vmul.f32 %v170_v14, %v80_v19 }
  0x4d   :  { %v87_v24 = vadd.f32 %v86_v21, %v79_v18  ;;  %v94_v25 = vmul.f32 %v159_v20, %v88_v22  ;;  %v96_v26 = vmul.f32 %v170_v14, %v88_v22 }
  0x4f   :  { %v95_v28 = vadd.f32 %v94_v25, %v87_v24  ;;  %v102_v29 = vmul.f32 %v160_v23, %v96_v26  ;;  %v104_v30 = vmul.f32 %v170_v14, %v96_v26 }
  0x51   :  { %v103_v32 = vadd.f32 %v102_v29, %v95_v28  ;;  %v110_v33 = vmul.f32 %v161_v27, %v104_v30  ;;  %v112_v34 = vmul.f32 %v170_v14, %v104_v30 }
  0x53   :  { %v111_v36 = vadd.f32 %v110_v33, %v103_v32  ;;  %v118_v37 = vmul.f32 %v162_v31, %v112_v34  ;;  %v120_v38 = vmul.f32 %v170_v14, %v112_v34 }
  0x55   :  { %v119_v40 = vadd.f32 %v118_v37, %v111_v36  ;;  %v126_v41 = vmul.f32 %v163_v35, %v120_v38  ;;  %v128_v42 = vmul.f32 %v170_v14, %v120_v38 }
  0x57   :  { %v127_v43 = vadd.f32 %v126_v41, %v119_v40  ;;  %v134_v44 = vmul.f32 %v164_v39, %v128_v42 }
  0x59   :  { %v135_v45 = vadd.f32 %v134_v44, %v127_v43 }
  0x5b   :  { %136 = vst [vmem:[#allocation9] sm:$0xff] %v135_v45 }
  0x5c   :  { %228 = shalt.err (!%p225_p6)
}
  0x5d   :  { %s229_s3 = scalar_lea.hbm %s343_s4, 128 }
  0x5e   :  { %p230_p7 = scmp.ne.s32.totalorder %s343_s4, %s229_s3  ;;  %p233_p8 = scmp.lt.u32.totalorder %s229_s3, %s343_s4 }
  0x60   :  { %p235_p9 = pnand %p233_p8, %p230_p7 }
  0x62   :  { %238 = shalt.err (!%p235_p9)
}
  0x63   :  { %146 = dma.vmem_to_hbm [thread:$0]  %s144_s8, 128, %s343_s4, [#allocation4]  }
  0x64   :  { %245 = dma.done.wait [#allocation4], 128  }
  0x65   :  { %246 = vsyncadd [#allocation4], 4294967168 }
  0x66   :  { %150 = vsyncpa [#allocation3], 1 }
  0x67   :  { %151 = vsyncpa [#allocation4], 1 }
  0x68   :  { %152 = vsyncpa [#allocation5], 1 }
  0x69   :  { %153 = vsyncpa [#allocation6], 1 }

</bundles_post_ra>
